<compile_context>
chip_gen: v6e
topology: v6e:2x2x1
jax: 0.10.0
libtpu: 0.0.40
codegen_flags: <defaults>
</compile_context>

<pallas_src>
import functools

import jax
import jax.numpy as jnp
from jax.experimental import pallas as pl
from jax.experimental.pallas import tpu as pltpu


def _round_up(x, m):
    return ((x + m - 1) // m) * m


def _oc_loss_kernel(scores_ref, labels_ref, out_ref, *,
                    n_valid, block_rows, row_width, n_arb,
                    r_real, r_fake, alpha, needs_mask):
    """Accumulate softplus(alpha*x) over one (block_rows, row_width) tile.

    out_ref is an (8, row_width) f32 block resident across the inner
    ('arbitrary') grid axis; it acts as a vector partial-sum accumulator.
    """
    k = pl.program_id(1)

    @pl.when(k == 0)
    def _init():
        out_ref[...] = jnp.zeros_like(out_ref)

    s = scores_ref[...].astype(jnp.float32)      # (TR, C), lane+sublane dense
    lab = labels_ref[...].astype(jnp.int32)      # unpack i8 -> i32 (native mask layout)

    # z = alpha * x with the margin constants folded in:
    #   lab == 0: x = r_real - (1 - s)  ->  z =  alpha*s + alpha*(r_real - 1)
    #   lab == 1: x = (1 - s) - r_fake  ->  z =  alpha*(1 - r_fake) - alpha*s
    #   else    : x = 1 - s             ->  z =  alpha             - alpha*s
    a_s = alpha * s
    neg = jnp.where(lab == 1, alpha * (1.0 - r_fake), alpha) - a_s
    z = jnp.where(lab == 0, a_s + alpha * (r_real - 1.0), neg)

    # numerically stable softplus(z) = max(z, 0) + log1p(exp(-|z|))
    sp = jnp.maximum(z, 0.0) + jnp.log1p(jnp.exp(-jnp.abs(z)))

    if needs_mask:
        # valid elements form a flat row-major prefix [0, n_valid)
        b = pl.program_id(0) * n_arb + k                      # row-block index
        row = b * block_rows + jax.lax.broadcasted_iota(jnp.int32, sp.shape, 0)
        col = jax.lax.broadcasted_iota(jnp.int32, sp.shape, 1)
        sp = jnp.where(row * row_width + col < n_valid, sp, 0.0)

    # (TR, C) -> (TR//8, 8, C) is a pure tile regrouping (no relayout);
    # summing the leading axis is vreg-wise VPU adds into the resident block.
    out_ref[...] += sp.reshape(block_rows // 8, 8, row_width).sum(axis=0)


def oc_loss(scores, labels, *, r_real=0.9, r_fake=0.5, alpha=20.0,
            row_width=1024, block_rows=256):
    """scores: (N,) float (f32/bf16), labels: (N,) int -> scalar f32 OCLoss.

    For best HBM throughput pass labels already as int8/uint8 (used as-is).
    """
    n = scores.shape[0]

    # ---- 2-D lane/sublane-dense layout -------------------------------------
    c = max(128, min(_round_up(int(row_width), 128), _round_up(n, 128)))
    rows = pl.cdiv(n, c)
    # block rows: multiple of 32 (covers f32 / bf16 / int8 sublane packing)
    if rows >= 32:
        tr = max(32, min(_round_up(int(block_rows), 32), (rows // 32) * 32))
    else:
        tr = 32
    r = max(rows, tr)                    # >= tr so a block never exceeds the array
    n_pad = r * c

    if labels.dtype == jnp.bool_:
        labels = labels.astype(jnp.int8)

    if n_pad != n:
        scores = jnp.pad(scores, (0, n_pad - n))
        labels = jnp.pad(labels, (0, n_pad - n))

    scores_2d = scores.reshape(r, c)     # layout plumbing only (no dtype cast)
    labels_2d = labels.reshape(r, c)

    nb = pl.cdiv(r, tr)                                    # row-block count
    n_par = 2 if (nb >= 2 and nb % 2 == 0) else 1          # v7x: 2-TC split
    n_arb = nb // n_par
    needs_mask = (n != n_par * n_arb * tr * c)

    kernel = functools.partial(
        _oc_loss_kernel,
        n_valid=n, block_rows=tr, row_width=c, n_arb=n_arb,
        r_real=float(r_real), r_fake=float(r_fake), alpha=float(alpha),
        needs_mask=needs_mask)

    partial_sums = pl.pallas_call(
        kernel,
        out_shape=jax.ShapeDtypeStruct((n_par * 8, c), jnp.float32),
        grid_spec=pltpu.PrefetchScalarGridSpec(
            num_scalar_prefetch=0,
            grid=(n_par, n_arb),
            in_specs=[pl.BlockSpec((tr, c), lambda p, k: (p * n_arb + k, 0)),
                      pl.BlockSpec((tr, c), lambda p, k: (p * n_arb + k, 0))],
            out_specs=pl.BlockSpec((8, c), lambda p, k: (p, 0)),
        ),
        compiler_params=pltpu.CompilerParams(
            dimension_semantics=("parallel", "arbitrary")),
    )(scores_2d, labels_2d)

    return jnp.sum(partial_sums) * jnp.float32(1.0 / n)


def _oc_loss_ref(scores, labels, r_real=0.9, r_fake=0.5, alpha=20.0):
    base = 1.0 - scores.astype(jnp.float32)
    x = jnp.where(labels == 0, r_real - base,
                  jnp.where(labels == 1, base - r_fake, base))
    return jnp.mean(jax.nn.softplus(alpha * x))


if __name__ == "__main__":
    key = jax.random.PRNGKey(0)
    k1, k2, k3, k4, k5, k6 = jax.random.split(key, 6)

    # 1) tiny batch (single block, mask path)
    n = 16
    scores = jax.random.uniform(k1, (n,), jnp.float32, minval=-1.0, maxval=1.0)
    labels = jax.random.randint(k2, (n,), 0, 2).astype(jnp.int8)
    loss = oc_loss(scores, labels)
    jax.block_until_ready(loss)
    ref = _oc_loss_ref(scores, labels)
    assert jnp.allclose(loss, ref, atol=1e-5, rtol=1e-5), (loss, ref)

    # 2) ragged batch, multi-step reduction, partial last block (mask path)
    n2 = 8892
    scores2 = jax.random.uniform(k3, (n2,), jnp.float32, minval=-1.0, maxval=1.0)
    labels2 = jax.random.randint(k4, (n2,), 0, 2).astype(jnp.int8)
    loss2 = oc_loss(scores2, labels2, row_width=128, block_rows=32)
    jax.block_until_ready(loss2)
    ref2 = _oc_loss_ref(scores2, labels2)
    assert jnp.allclose(loss2, ref2, atol=1e-5, rtol=1e-5), (loss2, ref2)

    # 3) aligned batch, even block count (no-mask + 2-way parallel grid), bf16 scores
    n3 = 16384
    scores3 = jax.random.uniform(k5, (n3,), jnp.float32,
                                 minval=-1.0, maxval=1.0).astype(jnp.bfloat16)
    labels3 = jax.random.randint(k6, (n3,), 0, 2).astype(jnp.int8)
    loss3 = oc_loss(scores3, labels3, row_width=128, block_rows=32)
    jax.block_until_ready(loss3)
    ref3 = _oc_loss_ref(scores3, labels3)
    assert jnp.allclose(loss3, ref3, atol=1e-4, rtol=1e-4), (loss3, ref3)

    print("KERNEL_OK")
</pallas_src>

<mosaic_0001>
module attributes {stable_mosaic.version = 11 : i64} {
  func.func @_oc_loss_kernel(%arg0: i32, %arg1: i32, %arg2: memref<32x128xf32, #tpu.memory_space<vmem>>, %arg3: memref<32x128xi8, #tpu.memory_space<vmem>>, %arg4: memref<8x128xf32, #tpu.memory_space<vmem>>) attributes {dimension_semantics = [#tpu.dimension_semantics<parallel>, #tpu.dimension_semantics<arbitrary>], iteration_bounds = array<i64: 1, 1>, scalar_prefetch = 0 : i64, scratch_operands = 0 : i64, tpu.core_type = #tpu.core_type<tc>, window_params = [{transform_indices = @transform_0, window_bounds = array<i64: 32, 128>}, {transform_indices = @transform_1, window_bounds = array<i64: 32, 128>}, {transform_indices = @transform_2, window_bounds = array<i64: 8, 128>}]} {
    %c0_i32 = arith.constant 0 : i32
    %0 = arith.cmpi eq, %arg1, %c0_i32 : i32
    %1 = arith.extui %0 : i1 to i32
    %c0_i32_0 = arith.constant 0 : i32
    %2 = arith.cmpi ne, %1, %c0_i32_0 : i32
    scf.if %2 {
      %cst_17 = arith.constant 0.000000e+00 : f32
      %46 = vector.broadcast %cst_17 : f32 to vector<8x128xf32>
      %c0_18 = arith.constant 0 : index
      %c0_19 = arith.constant 0 : index
      %47 = vector.load %arg4[%c0_18, %c0_19] : memref<8x128xf32, #tpu.memory_space<vmem>>, vector<8x128xf32>
      tpu.vector_store %arg4[%c0_18, %c0_19], %46 {strides = array<i32>} : memref<8x128xf32, #tpu.memory_space<vmem>>, vector<8x128xf32>,
    } else {
    }
    %c0 = arith.constant 0 : index
    %c0_1 = arith.constant 0 : index
    %3 = vector.load %arg2[%c0, %c0_1] : memref<32x128xf32, #tpu.memory_space<vmem>>, vector<32x128xf32>
    %c0_2 = arith.constant 0 : index
    %c0_3 = arith.constant 0 : index
    %4 = vector.load %arg3[%c0_2, %c0_3] : memref<32x128xi8, #tpu.memory_space<vmem>>, vector<32x128xi8>
    %5 = arith.extsi %4 : vector<32x128xi8> to vector<32x128xi32>
    %cst = arith.constant 2.000000e+01 : f32
    %6 = vector.broadcast %cst : f32 to vector<32x128xf32>
    %7 = arith.mulf %6, %3 : vector<32x128xf32>
    %c1_i32 = arith.constant 1 : i32
    %8 = vector.broadcast %c1_i32 : i32 to vector<32x128xi32>
    %9 = arith.cmpi eq, %5, %8 : vector<32x128xi32>
    %cst_4 = arith.constant 1.000000e+01 : f32
    %cst_5 = arith.constant 2.000000e+01 : f32
    %10 = vector.broadcast %cst_4 : f32 to vector<32x128xf32>
    %11 = vector.broadcast %cst_5 : f32 to vector<32x128xf32>
    %12 = arith.select %9, %10, %11 : vector<32x128xi1>, vector<32x128xf32>
    %13 = arith.subf %12, %7 : vector<32x128xf32>
    %c0_i32_6 = arith.constant 0 : i32
    %14 = vector.broadcast %c0_i32_6 : i32 to vector<32x128xi32>
    %15 = arith.cmpi eq, %5, %14 : vector<32x128xi32>
    %cst_7 = arith.constant -2.000000e+00 : f32
    %16 = vector.broadcast %cst_7 : f32 to vector<32x128xf32>
    %17 = arith.addf %7, %16 : vector<32x128xf32>
    %18 = arith.select %15, %17, %13 : vector<32x128xi1>, vector<32x128xf32>
    %cst_8 = arith.constant 0.000000e+00 : f32
    %19 = vector.broadcast %cst_8 : f32 to vector<32x128xf32>
    %20 = arith.maximumf %18, %19 : vector<32x128xf32>
    %21 = math.absf %18 : vector<32x128xf32>
    %cst_9 = arith.constant 0.000000e+00 : f32
    %22 = vector.broadcast %cst_9 : f32 to vector<32x128xf32>
    %23 = arith.subf %22, %21 : vector<32x128xf32>
    %24 = math.exp %23 : vector<32x128xf32>
    %25 = math.log1p %24 : vector<32x128xf32>
    %26 = arith.addf %20, %25 : vector<32x128xf32>
    %c1_i32_10 = arith.constant 1 : i32
    %27 = arith.muli %arg0, %c1_i32_10 : i32
    %28 = arith.addi %27, %arg1 : i32
    %c32_i32 = arith.constant 32 : i32
    %29 = arith.muli %28, %c32_i32 : i32
    %30 = tpu.iota {dimensions = array<i32: 0>} : vector<32x128xi32>
    %31 = vector.broadcast %29 : i32 to vector<32x128xi32>
    %32 = arith.addi %31, %30 : vector<32x128xi32>
    %33 = tpu.iota {dimensions = array<i32: 1>} : vector<32x128xi32>
    %c128_i32 = arith.constant 128 : i32
    %34 = vector.broadcast %c128_i32 : i32 to vector<32x128xi32>
    %35 = arith.muli %32, %34 : vector<32x128xi32>
    %36 = arith.addi %35, %33 : vector<32x128xi32>
    %c16_i32 = arith.constant 16 : i32
    %37 = vector.broadcast %c16_i32 : i32 to vector<32x128xi32>
    %38 = arith.cmpi slt, %36, %37 : vector<32x128xi32>
    %cst_11 = arith.constant 0.000000e+00 : f32
    %39 = vector.broadcast %cst_11 : f32 to vector<32x128xf32>
    %40 = arith.select %38, %26, %39 : vector<32x128xi1>, vector<32x128xf32>
    %c0_12 = arith.constant 0 : index
    %c0_13 = arith.constant 0 : index
    %41 = vector.load %arg4[%c0_12, %c0_13] : memref<8x128xf32, #tpu.memory_space<vmem>>, vector<8x128xf32>
    %42 = vector.shape_cast %40 : vector<32x128xf32> to vector<4x8x128xf32>
    %cst_14 = arith.constant dense<0.000000e+00> : vector<8x128xf32>
    %43 = vector.multi_reduction <add>, %42, %cst_14 [0] : vector<4x8x128xf32> to vector<8x128xf32>
    %44 = arith.addf %41, %43 : vector<8x128xf32>
    %c0_15 = arith.constant 0 : index
    %c0_16 = arith.constant 0 : index
    %45 = vector.load %arg4[%c0_15, %c0_16] : memref<8x128xf32, #tpu.memory_space<vmem>>, vector<8x128xf32>
    tpu.vector_store %arg4[%c0_15, %c0_16], %44 {strides = array<i32>} : memref<8x128xf32, #tpu.memory_space<vmem>>, vector<8x128xf32>,
    return
  }
  func.func @transform_0(%arg0: i32, %arg1: i32) -> (i32, i32) {
    %c1_i32 = arith.constant 1 : i32
    %0 = arith.muli %arg0, %c1_i32 : i32
    %1 = arith.addi %0, %arg1 : i32
    %c0_i32 = arith.constant 0 : i32
    %c0_i32_0 = arith.constant 0 : i32
    return %1, %c0_i32 : i32, i32
  }
  func.func @transform_1(%arg0: i32, %arg1: i32) -> (i32, i32) {
    %c1_i32 = arith.constant 1 : i32
    %0 = arith.muli %arg0, %c1_i32 : i32
    %1 = arith.addi %0, %arg1 : i32
    %c0_i32 = arith.constant 0 : i32
    %c0_i32_0 = arith.constant 0 : i32
    return %1, %c0_i32 : i32, i32
  }
  func.func @transform_2(%arg0: i32, %arg1: i32) -> (i32, i32) {
    %c0_i32 = arith.constant 0 : i32
    %c0_i32_0 = arith.constant 0 : i32
    return %arg0, %c0_i32 : i32, i32
  }
}

</mosaic_0001>

<bundles_post_ra>
// kernel: tpu_custom_call.1
= control target key start
LH: loop header
LB: loop body
LE: loop exit
PB: predicated region body
PF: predicated region fallthrough
CT: control target
= control target key end

     0   :  { %7 = vsyncpa [#allocation3], 0  ;;  %s349_s0 = inlined_call_operand.hbm [shape: f32[32,128], index: 0, kind: input, shape index: {}]   ;;  %s350_s1 = inlined_call_operand.hbm [shape: s8[32,128], index: 1, kind: input, shape index: {}]   ;;  %s351_s2 = inlined_call_operand.hbm [shape: f32[8,128], index: 2, kind: output, shape index: {}]  }
   0x1   :  { %8 = vsyncpa [#allocation6], 0 }
   0x2   :  { %9 = vsyncpa [#allocation4], 0  ;;  %s291_s9 = smov [#allocation2]  }
   0x3   :  { %s19_s10 = sshll.u32 %s291_s9, 4  ;;  %s20_s10 = int_to_ptr.vmem [resolvable:$true] %s19_s10 }
   0x4   :  { %s233_s11 = scalar_lea.vmem %s20_s10, 512  ;;  %p238_p1 = scmp.lt.s32.totalorder %s20_s10, %s20_s10 }
   0x5   :  { %p234_p0 = scmp.ne.s32.totalorder %s20_s10, %s233_s11  ;;  %p239_p2 = scmp.lt.s32.totalorder %s233_s11, %s233_s11 }
   0x7   :  { %p240_p3 = por %p239_p2, %p238_p1 }
   0x9   :  { %p241_p4 = pnand %p240_p3, %p234_p0 }
   0xb   :  { %244 = shalt.err (!%p241_p4)
}
   0xc   :  { %s292_s12 = smov 128   ;;  %s293_s13 = smov 8  }
   0xd   :  { %25 = dma.hbm_to_vmem [thread:$0]  %s349_s0, 512, %s20_s10, [#allocation3], %s292_s12, %s292_s12, %s293_s13  }
   0xe   :  { %s294_s16 = smov [#allocation5]  }
   0xf   :  { %s35_s17 = sshll.u32 %s294_s16, 4  ;;  %s36_s17 = int_to_ptr.vmem [resolvable:$true] %s35_s17 }
  0x10   :  { %s253_s18 = scalar_lea.vmem %s36_s17, 128  ;;  %p258_p6 = scmp.lt.s32.totalorder %s36_s17, %s36_s17 }
  0x11   :  { %p254_p5 = scmp.ne.s32.totalorder %s36_s17, %s253_s18  ;;  %p259_p7 = scmp.lt.s32.totalorder %s253_s18, %s253_s18 }
  0x13   :  { %p260_p8 = por %p259_p7, %p258_p6 }
  0x15   :  { %p261_p9 = pnand %p260_p8, %p254_p5 }
  0x17   :  { %264 = shalt.err (!%p261_p9)
}
  0x18   :  { %38 = dma.hbm_to_vmem [thread:$0]  %s350_s1, 128, %s36_s17, [#allocation6]  }
  0x19   :  { %285 = dma.done.wait [#allocation3], 512  }
  0x1a   :  { %286 = vsyncadd [#allocation3], 4294966784 }
  0x1b   :  { %287 = dma.done.wait [#allocation6], 128  }
  0x1c   :  { %288 = vsyncadd [#allocation6], 4294967168  ;;  %v53_v0 = vld [vmem:[#allocation2] sm:$0xff]  ;;  %v54_v1 = vld [vmem:[#allocation2 + $0x8] sm:$0xff]  ;;  %v295_v16 = vmov 20.0   ;;  %v152_v42 = vlaneseq  ;;  %s296_s0 = smov [#allocation7]  }
  0x1d   :  { %v55_v2 = vld [vmem:[#allocation2 + $0x10] sm:$0xff]  ;;  %v56_v3 = vld [vmem:[#allocation2 + $0x18] sm:$0xff]  ;;  %v57_v4 = vld [vmem:[#allocation5] sm:$0xff]  ;;  %v62_v5 = vmul.f32 20.0, %v53_v0  ;;  %v63_v6 = vmul.f32 20.0, %v54_v1  ;;  %s192_s1 = sshll.u32 %s296_s0, 4  ;;  %s193_s1 = int_to_ptr.vmem [resolvable:$true] %s192_s1 }
  0x1e   :  { %v64_v7 = vmul.f32 20.0, %v55_v2  ;;  %v58_v8 = vunpack.c.0.s8 %v57_v4  ;;  %v59_v9 = vunpack.c.1.s8 %v57_v4  ;;  %v60_v10 = vunpack.c.2.s8 %v57_v4  ;;  %s265_s21 = scalar_lea.vmem %s193_s1, 128  ;;  %p270_p11 = scmp.lt.s32.totalorder %s193_s1, %s193_s1 }
  0x1f   :  { %v61_v11 = vunpack.c.3.s8 %v57_v4  ;;  %v65_v12 = vmul.f32 20.0, %v56_v3  ;;  %v82_v13 = vadd.f32 -2.0, %v62_v5  ;;  %v83_v14 = vadd.f32 -2.0, %v63_v6  ;;  %p266_p10 = scmp.ne.s32.totalorder %s193_s1, %s265_s21  ;;  %p271_p12 = scmp.lt.s32.totalorder %s265_s21, %s265_s21 }
  0x20   :  { %v84_v15 = vadd.f32 -2.0, %v64_v7  ;;  %vm66_vm0 = vcmp.eq.s32.totalorder %v58_v8, 1  ;;  %vm67_vm1 = vcmp.eq.s32.totalorder %v59_v9, 1  ;;  %vm68_vm2 = vcmp.eq.s32.totalorder %v60_v10, 1 }
  0x21   :  { %vm69_vm3 = vcmp.eq.s32.totalorder %v61_v11, 1  ;;  %v70_v17 = vsel %vm66_vm0, 10.0, %v295_v16  ;;  %v71_v18 = vsel %vm67_vm1, 10.0, %v295_v16  ;;  %v72_v19 = vsel %vm68_vm2, 10.0, %v295_v16  ;;  %p272_p13 = por %p271_p12, %p270_p11 }
  0x22   :  { %v73_v20 = vsel %vm69_vm3, 10.0, %v295_v16  ;;  %v74_v21 = vsub.f32 %v70_v17, %v62_v5  ;;  %v75_v22 = vsub.f32 %v71_v18, %v63_v6  ;;  %v76_v23 = vsub.f32 %v72_v19, %v64_v7 }
  0x23   :  { %v77_v24 = vsub.f32 %v73_v20, %v65_v12  ;;  %vm78_vm4 = vcmp.eq.s32.totalorder %v58_v8, 0  ;;  %vm79_vm5 = vcmp.eq.s32.totalorder %v59_v9, 0  ;;  %vm80_vm6 = vcmp.eq.s32.totalorder %v60_v10, 0  ;;  %p273_p0 = pnand %p272_p13, %p266_p10 }
  0x24   :  { %vm81_vm7 = vcmp.eq.s32.totalorder %v61_v11, 0  ;;  %v85_v25 = vadd.f32 -2.0, %v65_v12  ;;  %v318_v26 = vsel %vm78_vm4, %v82_v13, %v74_v21  ;;  %v320_v27 = vsel %vm79_vm5, %v83_v14, %v75_v22 }
  0x25   :  { %v322_v28 = vsel %vm80_vm6, %v84_v15, %v76_v23  ;;  %v94_v29 = vand.u32 2147483647, %v318_v26  ;;  %v95_v31 = vand.u32 2147483647, %v320_v27  ;;  %v153_v48 = vshrl.u32 %v152_v42, 7 }
  0x26   :  { %v325_v30 = vsel %vm81_vm7, %v85_v25, %v77_v24  ;;  %v96_v32 = vand.u32 2147483647, %v322_v28  ;;  %v163_v58 = vand.u32 127, %v152_v42  ;;  %v90_v8 = vmax.f32 %v318_v26, 0.0 }
  0x27   :  { %v97_v33 = vand.u32 2147483647, %v325_v30  ;;  %v98_v34 = vsub.f32 0.0, %v94_v29  ;;  %v99_v35 = vsub.f32 0.0, %v95_v31  ;;  %v154_v52 = vadd.s32 8, %v153_v48 }
  0x28   :  { %v100_v36 = vsub.f32 0.0, %v96_v32  ;;  %v155_v56 = vadd.s32 16, %v153_v48  ;;  %v156_v57 = vadd.s32 24, %v153_v48  ;;  %v164_v59 = vmul.u32 128, %v153_v48 }
  0x29   :  { %v101_v37 = vsub.f32 0.0, %v97_v33  ;;  %v102_v38 = vmul.f32 1.442695, %v98_v34  ;;  %v104_v39 = vmul.f32 1.442695, %v99_v35  ;;  %v165_v60 = vmul.u32 128, %v154_v52 }
  0x2a   :  { %v106_v40 = vmul.f32 1.442695, %v100_v36  ;;  %v166_v3 = vmul.u32 128, %v155_v56  ;;  %v167_v5 = vmul.u32 128, %v156_v57  ;;  %v168_v6 = vadd.s32 %v164_v59, %v163_v58 }
  0x2b   :  { %209 = vpow2.f32 %v102_v38  ;;  %v108_v41 = vmul.f32 1.442695, %v101_v37  ;;  %v169_v7 = vadd.s32 %v165_v60, %v163_v58  ;;  %v91_v9 = vmax.f32 %v320_v27, 0.0 }
  0x2c   :  { %211 = vpow2.f32 %v104_v39  ;;  %v92_v13 = vmax.f32 %v322_v28, 0.0  ;;  %v170_v21 = vadd.s32 %v166_v3, %v163_v58  ;;  %v93_v23 = vmax.f32 %v325_v30, 0.0 }
  0x2d   :  { %213 = vpow2.f32 %v106_v40  ;;  %v171_v25 = vadd.s32 %v167_v5, %v163_v58  ;;  %vm172_vm11 = vcmp.lt.s32.totalorder %v168_v6, 16  ;;  %vm173_vm13 = vcmp.lt.s32.totalorder %v169_v7, 16 }
  0x2e   :  { %215 = vpow2.f32 %v108_v41  ;;  %vm174_vm14 = vcmp.lt.s32.totalorder %v170_v21, 16 }
  0x2f   :  { %vm175_vm15 = vcmp.lt.s32.totalorder %v171_v25, 16 }
  0x38   :  { %v210_v43 = vpop.eup %209 }
  0x39   :  { %v212_v44 = vpop.eup %211  ;;  %v110_v45 = vadd.f32 1.0, %v210_v43  ;;  %v113_v53 = vmul.f32 -0.5, %v210_v43  ;;  %v116_v63 = vand.u32 2147483647, %v210_v43 }
  0x3a   :  { %v214_v46 = vpop.eup %213  ;;  %v119_v47 = vadd.f32 1.0, %v212_v44  ;;  %v122_v54 = vmul.f32 -0.5, %v212_v44  ;;  %v125_v1 = vand.u32 2147483647, %v212_v44 }
  0x3b   :  { %v216_v49 = vpop.eup %215  ;;  %217 = vlog2.f32 %v110_v45  ;;  %v128_v50 = vadd.f32 1.0, %v214_v46  ;;  %v131_v55 = vmul.f32 -0.5, %v214_v46  ;;  %v114_v61 = vadd.f32 1.0, %v113_v53 }
  0x3c   :  { %219 = vlog2.f32 %v119_v47  ;;  %v137_v51 = vadd.f32 1.0, %v216_v49  ;;  %v140_v62 = vmul.f32 -0.5, %v216_v49  ;;  %v123_v0 = vadd.f32 1.0, %v122_v54 }
  0x3d   :  { %221 = vlog2.f32 %v128_v50  ;;  %v132_v2 = vadd.f32 1.0, %v131_v55  ;;  %v134_v4 = vand.u32 2147483647, %v214_v46  ;;  %v115_v10 = vmul.f32 %v210_v43, %v114_v61 }
  0x3e   :  { %223 = vlog2.f32 %v137_v51  ;;  %v141_v11 = vadd.f32 1.0, %v140_v62  ;;  %vm333_vm8 = vcmp.lt.f32.partialorder %v116_v63, 0.0004427343  ;;  %v124_v15 = vmul.f32 %v212_v44, %v123_v0 }
  0x3f   :  { %v143_v16 = vand.u32 2147483647, %v216_v49  ;;  %vm337_vm9 = vcmp.lt.f32.partialorder %v125_v1, 0.0004427343  ;;  %v133_v20 = vmul.f32 %v214_v46, %v132_v2  ;;  %vm135_vm10 = vcmp.lt.f32.partialorder %v134_v4, 0.0004427343 }
  0x40   :  { %v142_v28 = vmul.f32 %v216_v49, %v141_v11 }
  0x41   :  { %vm144_vm12 = vcmp.lt.f32.partialorder %v143_v16, 0.0004427343 }
  0x48   :  { %v218_v12 = vpop.eup %217 }
  0x49   :  { %v220_v17 = vpop.eup %219  ;;  %v112_v18 = vmul.f32 0.6931472, %v218_v12 }
  0x4a   :  { %v222_v22 = vpop.eup %221  ;;  %v121_v24 = vmul.f32 0.6931472, %v220_v17 }
  0x4b   :  { %v118_v26 = vsel %vm333_vm8, %v115_v10, %v112_v18  ;;  %v130_v27 = vmul.f32 0.6931472, %v222_v22  ;;  %v224_v29 = vpop.eup %223 }
  0x4c   :  { %v127_v31 = vsel %vm337_vm9, %v124_v15, %v121_v24  ;;  %v146_v32 = vadd.f32 %v118_v26, %v90_v8  ;;  %v139_v34 = vmul.f32 0.6931472, %v224_v29 }
  0x4d   :  { %v136_v33 = vsel %vm135_vm10, %v133_v20, %v130_v27  ;;  %v147_v35 = vadd.f32 %v127_v31, %v91_v9 }
  0x4e   :  { %v148_v30 = vadd.f32 %v136_v33, %v92_v13  ;;  %v176_v36 = vsel %vm172_vm11, %v146_v32, 0.0  ;;  %v145_v37 = vsel %vm144_vm12, %v142_v28, %v139_v34 }
  0x4f   :  { %v177_v38 = vsel %vm173_vm13, %v147_v35, 0.0  ;;  %v149_v39 = vadd.f32 %v145_v37, %v93_v23 }
  0x50   :  { %v178_v40 = vsel %vm174_vm14, %v148_v30, 0.0  ;;  %v181_v41 = vadd.f32 %v177_v38, %v176_v36 }
  0x51   :  { %v179_v42 = vsel %vm175_vm15, %v149_v39, 0.0 }
  0x52   :  { %v182_v43 = vadd.f32 %v181_v41, %v178_v40 }
  0x54   :  { %v183_v44 = vadd.f32 %v182_v43, %v179_v42 }
  0x56   :  { %185 = vst [vmem:[#allocation7] sm:$0xff] %v183_v44 }
  0x57   :  { %276 = shalt.err (!%p273_p0)
}
  0x58   :  { %195 = dma.vmem_to_hbm [thread:$0]  %s193_s1, 128, %s351_s2, [#allocation4]  }
  0x59   :  { %289 = dma.done.wait [#allocation4], 128  }
  0x5a   :  { %290 = vsyncadd [#allocation4], 4294967168 }
  0x5b   :  { %199 = vsyncpa [#allocation3], 1 }
  0x5c   :  { %200 = vsyncpa [#allocation6], 1 }
  0x5d   :  { %201 = vsyncpa [#allocation4], 1 }

</bundles_post_ra>
